<compile_context>
chip_gen: v6e
topology: v6e:2x2x1
jax: 0.10.0
libtpu: 0.0.40
codegen_flags: <defaults>
</compile_context>

<pallas_src>
import math

import jax
import jax.numpy as jnp
from jax.experimental import pallas as pl
from jax.experimental.pallas import tpu as pltpu


def _make_frequency_values(max_res=15.0, min_res=15.0 / 2000.0, div_factor=4):
    """float32 frequency values matching the PyTorch module (6 of them)."""
    n_freq = int(math.log(max_res / min_res, div_factor)) + 1
    return tuple(
        float(jnp.float32(2.0 * math.pi * (float(div_factor) ** k) / max_res))
        for k in range(n_freq)
    )


def _round_up(n, m):
    return ((n + m - 1) // m) * m


def _make_kernel(nf):
    def kernel(freq_ref, x_ref, o_ref):
        # freq_ref: (8, 1)  frequency column (rows >= nf are zero padding)
        # x_ref:    (1, tn) squared distances, lane-dense
        # o_ref:    (tn, 2*nf) row-major output tile
        xs = jnp.sqrt(x_ref[...] + 1e-8)                 # (1, tn)
        emb = freq_ref[...] * xs                         # (8, tn) lane-dense
        s = jnp.sin(emb)                                 # (8, tn) VALU work on
        c = jnp.cos(emb)                                 # full vregs
        st = s.T                                         # (tn, 8) XLU transpose
        ct = c.T                                         # (tn, 8)
        # Single dense full-block store of [sin | cos] columns.
        o_ref[...] = jnp.concatenate([st[:, :nf], ct[:, :nf]], axis=1)

    return kernel


def sinusoids_embedding(x, freq_values, *, block_cols=8192):
    """x: (N, 1) float -> (N, 2*n_freq) float32, matching the PyTorch module."""
    assert x.ndim == 2 and x.shape[1] == 1, "expected x of shape (N, 1)"
    N = x.shape[0]
    nf = len(freq_values)
    nf_pad = 8                       # pad feature rows to one sublane group
    out_dim = 2 * nf

    # (N, 1) -> (1, N): pure reshape (no data movement), N maps to lanes.
    xf = x.reshape(1, N).astype(jnp.float32)

    # Constant frequency column, resident in VMEM for the whole grid.
    freq_col = (
        jnp.zeros((nf_pad, 1), jnp.float32)
        .at[:nf, 0]
        .set(jnp.asarray(freq_values, dtype=jnp.float32))
    )

    # Tile width: multiple of 128, capped so the grid has >= 2 (ideally ~4)
    # steps for v7x megacore sharding, and so per-step VMEM stays small.
    block_cols = max(128, _round_up(block_cols, 128))
    tn = min(block_cols, max(128, _round_up(pl.cdiv(N, 4), 128)))
    n_pad = _round_up(N, tn)
    if n_pad != N:
        xf = jnp.pad(xf, ((0, 0), (0, n_pad - N)))

    kernel = _make_kernel(nf)

    out = pl.pallas_call(
        kernel,
        out_shape=jax.ShapeDtypeStruct((n_pad, out_dim), jnp.float32),
        grid_spec=pltpu.PrefetchScalarGridSpec(
            num_scalar_prefetch=0,
            grid=(n_pad // tn,),
            in_specs=[
                pl.BlockSpec((nf_pad, 1), lambda i: (0, 0)),   # freqs: resident
                pl.BlockSpec((1, tn), lambda i: (0, i)),       # x column tile
            ],
            out_specs=pl.BlockSpec((tn, out_dim), lambda i: (i, 0)),
        ),
        compiler_params=pltpu.CompilerParams(
            dimension_semantics=("parallel",),
            vmem_limit_bytes=32 * 1024 * 1024,
        ),
    )(freq_col, xf)

    # Drop padded tail rows (no-op when N is already tile-aligned).
    return out if n_pad == N else out[:N]


def reference(x, freq_values):
    freqs = jnp.asarray(freq_values, dtype=jnp.float32)
    xs = jnp.sqrt(x.astype(jnp.float32) + 1e-8)
    emb = xs * freqs[None, :]
    return jnp.concatenate([jnp.sin(emb), jnp.cos(emb)], axis=-1)


if __name__ == "__main__":
    key = jax.random.PRNGKey(0)
    N = 256
    # Squared distances: strictly positive, small scale.
    x = jax.random.uniform(key, (N, 1), dtype=jnp.float32, minval=0.0, maxval=1.0)

    freq_values = _make_frequency_values()   # 6 frequencies -> dim 12

    out = sinusoids_embedding(x, freq_values)
    out = jax.block_until_ready(out)

    ref = reference(x, freq_values)
    assert out.shape == (N, 2 * len(freq_values))
    # Tolerance allows for sin/cos range-reduction differences between the
    # Mosaic and XLA f32 transcendental implementations at large arguments.
    assert jnp.allclose(out, ref, atol=1e-4, rtol=1e-4), "mismatch vs reference"

    print("KERNEL_OK")
</pallas_src>

<mosaic_0001>
module attributes {stable_mosaic.version = 11 : i64} {
  func.func @kernel(%arg0: i32, %arg1: memref<8x1xf32, #tpu.memory_space<vmem>>, %arg2: memref<1x128xf32, #tpu.memory_space<vmem>>, %arg3: memref<128x12xf32, #tpu.memory_space<vmem>>) attributes {dimension_semantics = [#tpu.dimension_semantics<parallel>], iteration_bounds = array<i64: 2>, scalar_prefetch = 0 : i64, scratch_operands = 0 : i64, tpu.core_type = #tpu.core_type<tc>, window_params = [{pipeline_mode = #tpu.pipeline_mode<synchronous>, transform_indices = @transform_0, window_bounds = array<i64: 8, 1>}, {transform_indices = @transform_1, window_bounds = array<i64: 1, 128>}, {transform_indices = @transform_2, window_bounds = array<i64: 128, 12>}]} {
    %c0 = arith.constant 0 : index
    %c0_0 = arith.constant 0 : index
    %0 = vector.load %arg2[%c0, %c0_0] : memref<1x128xf32, #tpu.memory_space<vmem>>, vector<1x128xf32>
    %cst = arith.constant 9.99999993E-9 : f32
    %1 = vector.broadcast %cst : f32 to vector<1x128xf32>
    %2 = arith.addf %0, %1 : vector<1x128xf32>
    %3 = math.sqrt %2 : vector<1x128xf32>
    %c0_1 = arith.constant 0 : index
    %c0_2 = arith.constant 0 : index
    %4 = vector.load %arg1[%c0_1, %c0_2] : memref<8x1xf32, #tpu.memory_space<vmem>>, vector<8x1xf32>
    %5 = vector.broadcast %4 : vector<8x1xf32> to vector<8x128xf32>
    %6 = vector.broadcast %3 : vector<1x128xf32> to vector<8x128xf32>
    %7 = arith.mulf %5, %6 : vector<8x128xf32>
    %8 = math.sin %7 : vector<8x128xf32>
    %9 = math.cos %7 : vector<8x128xf32>
    %10 = tpu.transpose %8, [1, 0] : vector<8x128xf32> -> vector<128x8xf32>
    %11 = tpu.transpose %9, [1, 0] : vector<8x128xf32> -> vector<128x8xf32>
    %12 = vector.extract_strided_slice %10 {offsets = [0, 0], sizes = [128, 6], strides = [1, 1]} : vector<128x8xf32> to vector<128x6xf32>
    %13 = vector.extract_strided_slice %11 {offsets = [0, 0], sizes = [128, 6], strides = [1, 1]} : vector<128x8xf32> to vector<128x6xf32>
    %14 = tpu.concatenate %12, %13 in 1 : vector<128x6xf32>, vector<128x6xf32> -> vector<128x12xf32>
    %c0_3 = arith.constant 0 : index
    %c0_4 = arith.constant 0 : index
    %15 = vector.load %arg3[%c0_3, %c0_4] : memref<128x12xf32, #tpu.memory_space<vmem>>, vector<128x12xf32>
    tpu.vector_store %arg3[%c0_3, %c0_4], %14 {strides = array<i32>} : memref<128x12xf32, #tpu.memory_space<vmem>>, vector<128x12xf32>,
    return
  }
  func.func @transform_0(%arg0: i32) -> (i32, i32) {
    %c0_i32 = arith.constant 0 : i32
    %c0_i32_0 = arith.constant 0 : i32
    %c0_i32_1 = arith.constant 0 : i32
    return %c0_i32, %c0_i32_0 : i32, i32
  }
  func.func @transform_1(%arg0: i32) -> (i32, i32) {
    %c0_i32 = arith.constant 0 : i32
    %c0_i32_0 = arith.constant 0 : i32
    return %c0_i32, %arg0 : i32, i32
  }
  func.func @transform_2(%arg0: i32) -> (i32, i32) {
    %c0_i32 = arith.constant 0 : i32
    %c0_i32_0 = arith.constant 0 : i32
    return %arg0, %c0_i32 : i32, i32
  }
}

</mosaic_0001>

<bundles_post_ra>
// kernel: tpu_custom_call.1
= control target key start
LH: loop header
LB: loop body
LE: loop exit
PB: predicated region body
PF: predicated region fallthrough
CT: control target
= control target key end

     0   :  { %s659_s9 = smov 0   ;;  %s771_s0 = inlined_call_operand.vmem [shape: f32[8,1], index: 0, kind: input, shape index: {}]   ;;  %s772_s1 = inlined_call_operand.vmem [shape: f32[1,256], index: 1, kind: input, shape index: {}]   ;;  %s773_s2 = inlined_call_operand.vmem [shape: f32[256,12], index: 2, kind: output, shape index: {}]  }
   0x1 LB: > { %s665_s10 = sadd.s32 4294967295, %s634_s9   ;;  %p587_p0 = scmp.ge.s32.totalorder %s634_s9, 1  ;;  %s634_s9 = sphi %s659_s9, %s12_s9  }
   0x2   : > { %p110_p1 = scmp.lt.s32.totalorder %s634_s9, 3 }
   0x4   : > { %p111_p2 = pnand %p587_p0, %p110_p1 }
   0x5   : > { %p130_p3 = scmp.lt.s32.totalorder (!%p111_p2), %s665_s10, 1  ;;  %s643_s17 = smov (!%p111_p2), 6  }
   0x6   : > { %114 = sbr.rel (%p111_p2) target bundleno = 523 (0x20b), region = 28  ;;  %s588_s18 = sshll.u32 (!%p111_p2), %s665_s10, 4 }
   0x7   : > { %p134_p4 = scmp.lt.s32.totalorder (!%p111_p2), %s588_s18, 31 }
   0xb   : > { %v148_v0 = vld [vmem:[%s771_s0] sm:$0xff]  ;;  %v636_v1 = vmov 0   ;;  %s131_s13 = scalar_select %p130_p3, %s665_s10, 1  ;;  %v155_v5 = vlaneseq  ;;  %v637_v26 = vmov 2102212464  }
   0xc   : > { %621 = vset.pattern.permute.xlu0 %v636_v1  ;;  %v638_v28 = vmov 920167782   ;;  %v639_v32 = vmov 1326507024   ;;  %v640_v34 = vmov 683565275  }
   0xd   : > { %151 = vperm.xlu0 %621, %v148_v0   ;;  %s132_s16 = scalar_lea.vmem %s772_s1, %s131_s13  ;;  %v156_v7 = vshrl.u32 %v155_v5, 7  ;;  %v641_v36 = vmov 2475754826   ;;  %v642_v39 = vmov 2131351028   ;;  %s775_s18 = smov (!%p134_p4, %s588_s18), 31 }
   0xe   : > { %v139_v2 = vld [vmem:[%s132_s16] sm:$0x1]  ;;  %s589_s19 = sshll.u32 %s775_s18, 3 }
   0xf   : > { %v140_v3 = vadd.f32 1e-08, %v139_v2  ;;  %v157_v10 = vsub.s32 0, %v156_v7  ;;  %s718_s22 = scalar_lea.vmem %s773_s2, %s589_s19 }
  0x11   : > { %622 = vrsqrt.f32 %v140_v3  ;;  %vm143_vm0 = vcmp.eq.f32.partialorder %v140_v3, inf  ;;  %v146_v8 = vand.u32 2147483648, %v140_v3  ;;  %vm145_vm1 = vcmp.eq.f32.partialorder %v140_v3, 0.0 }
  0x1e   : > { %v623_v4 = vpop.eup %622 }
  0x1f   : > { %v142_v6 = vmul.f32 %v623_v4, %v140_v3 }
  0x21   : > { %v144_v9 = vsel %vm143_vm0, %v140_v3, %v142_v6 }
  0x22   : > { %v147_v11 = vsel %vm145_vm1, %v146_v8, %v144_v9 }
  0x23   : > { %v158_v12 = vrot.slane %v147_v11, %v157_v10 }
  0x88   : > { %v152_v13 = vpop.permute.xlu0 %151 }
  0x89   : > { %v677_v14 = vmul.f32 %v158_v12, %v152_v13 }
  0x8b   : > { %v164_v15 = vand.u32 2139095040, %v677_v14  ;;  %v161_v16 = vand.u32 2147483647, %v677_v14  ;;  %vm163_vm9 = vcmp.lt.s32.totalorder %v677_v14, 0  ;;  %vm253_vm1 = vweird.f32 %v677_v14 }
  0x8d   : > { %v165_v17 = vshrl.u32 %v164_v15, 23  ;;  %v168_v19 = vand.u32 8388607, %v161_v16  ;;  %vm162_vm10 = vcmp.le.f32.partialorder %v161_v16, 0.7853982 }
  0x8f   : > { %v590_v18 = vadd.s32 4294967169, %v165_v17  ;;  %v169_v22 = vor.u32 8388608, %v168_v19 }
  0x91   : > { %v171_v20 = vadd.s32 1, %v590_v18  ;;  %v209_v30 = vshll.u32 %v169_v22, 8 }
  0x93   : > { %vm172_vm2 = vcmp.gt.s32.totalorder %v171_v20, 0 }
  0x94   : > { %v173_v21 = vsel %vm172_vm2, %v171_v20, 0  ;;  %vm496_vm2 = vcmask 48128  }
  0x95   : > { %v175_v23 = vand.u32 31, %v173_v21  ;;  %v174_v24 = vshrl.u32 %v173_v21, 5 }
  0x97   : > { %v176_v25 = vsub.s32 32, %v175_v23  ;;  %v187_v27 = vshll.u32 %v637_v26, %v175_v23  ;;  %v190_v29 = vshll.u32 %v638_v28, %v175_v23  ;;  %v178_v35 = vshll.u32 %v640_v34, %v175_v23 }
  0x98   : > { %v181_v38 = vshll.u32 %v641_v36, %v175_v23  ;;  %v184_v41 = vshll.u32 %v642_v39, %v175_v23  ;;  %vm196_vm3 = vcmp.lt.s32.totalorder %v174_v24, 4  ;;  %vm193_vm4 = vcmp.lt.s32.totalorder %v174_v24, 1 }
  0x99   : > { %v188_v31 = vshrl.u32 %v638_v28, %v176_v25  ;;  %v191_v33 = vshrl.u32 %v639_v32, %v176_v25  ;;  %v179_v37 = vshrl.u32 %v641_v36, %v176_v25  ;;  %v182_v40 = vshrl.u32 %v642_v39, %v176_v25 }
  0x9a   : > { %v185_v42 = vshrl.u32 %v637_v26, %v176_v25  ;;  %v177_v46 = vshrl.u32 %v640_v34, %v176_v25  ;;  %vm194_vm5 = vcmp.lt.s32.totalorder %v174_v24, 2  ;;  %vm195_vm6 = vcmp.lt.s32.totalorder %v174_v24, 3 }
  0x9b   : > { %v189_v43 = vor.u32 %v188_v31, %v187_v27  ;;  %v192_v44 = vor.u32 %v191_v33, %v190_v29  ;;  %v180_v45 = vor.u32 %v179_v37, %v178_v35  ;;  %v183_v47 = vor.u32 %v182_v40, %v181_v38 }
  0x9c   : > { %v186_v48 = vor.u32 %v185_v42, %v184_v41 }
  0x9d   : > { %v202_v49 = vsel %vm196_vm3, %v189_v43, 920167782  ;;  %v206_v50 = vsel %vm196_vm3, %v192_v44, 1326507024  ;;  %v201_v52 = vsel %vm193_vm4, %v180_v45, %v183_v47  ;;  %v197_v55 = vsel %vm193_vm4, %v177_v46, %v180_v45 }
  0x9e   : > { %v198_v51 = vsel %vm196_vm3, %v186_v48, 2102212464  ;;  %v203_v53 = vsel %vm195_vm6, %v186_v48, %v202_v49  ;;  %v205_v54 = vsel %vm193_vm4, %v183_v47, %v186_v48  ;;  %v207_v58 = vsel %vm195_vm6, %v189_v43, %v206_v50 }
  0x9f   : > { %v199_v56 = vsel %vm195_vm6, %v183_v47, %v198_v51  ;;  %v204_v57 = vsel %vm194_vm5, %v201_v52, %v203_v53  ;;  %v208_v59 = vsel %vm194_vm5, %v205_v54, %v207_v58  ;;  %vm513_vm3 = vcmask 97280  }
  0xa0   : > { %v683_v60 = vmul.u32.u64.low %v209_v30, %v204_v57  ;;  %v684_v61 = vmul.u32.u64.high %v209_v30, %v204_v57, %v683_v60  ;;  %v686_v62 = vmul.u32.u64.low %v209_v30, %v208_v59  ;;  %v687_v63 = vmul.u32.u64.high %v209_v30, %v208_v59, %v686_v62 }
  0xa1   : > { %v200_v0 = vsel %vm194_vm5, %v197_v55, %v199_v56 }
  0xa2   : > { %v219_v1 = vadd.s32 1, %v684_v61  ;;  %v216_v2 = vmul.u32 %v209_v30, %v200_v0  ;;  %vm218_vm7 = vc.u32 %v687_v63, %v683_v60  ;;  %v217_v15 = vadd.s32 %v683_v60, %v687_v63 }
  0xa4   : > { %v220_v3 = vsel %vm218_vm7, %v219_v1, %v684_v61 }
  0xa5   : > { %v221_v4 = vadd.s32 %v220_v3, %v216_v2 }
  0xa7   : > { %v222_v5 = vadd.s32 536870912, %v221_v4 }
  0xa9   : > { %v223_v6 = vshrl.u32 %v222_v5, 30 }
  0xab   : > { %v224_v7 = vshll.u32 %v223_v6, 30  ;;  %v247_v29 = vsub.s32 4, %v223_v6 }
  0xad   : > { %v225_v8 = vsub.s32 %v221_v4, %v224_v7  ;;  %v248_v32 = vsel %vm163_vm9, %v247_v29, %v223_v6 }
  0xae   : > { %v250_v33 = vsel %vm162_vm10, 0, %v248_v32 }
  0xaf   : > { %v227_v9 = vsub.s32 0, %v225_v8  ;;  %v254_v34 = vadd.s32 3, %v250_v33  ;;  %v358_v35 = vand.u32 3, %v250_v33 }
  0xb1   : > { %v591_v10 = vmin.u32 %v227_v9, %v225_v8  ;;  %v255_v36 = vand.u32 3, %v254_v34  ;;  %vm363_vm11 = vcmp.eq.s32.totalorder %v358_v35, 2  ;;  %vm360_vm13 = vcmp.eq.s32.totalorder %v358_v35, 0 }
  0xb2   : > { %vm359_vm15 = vcmp.lt.s32.totalorder %v358_v35, 2 }
  0xb3   : > { %v229_v11 = vclz %v591_v10  ;;  %vm260_vm12 = vcmp.eq.s32.totalorder %v255_v36, 2  ;;  %vm257_vm14 = vcmp.eq.s32.totalorder %v255_v36, 0  ;;  %vm256_vm0 = vcmp.lt.s32.totalorder %v255_v36, 2 }
  0xb5   : > { %v592_v12 = vadd.s32 4294967294, %v229_v11 }
  0xb7   : > { %vm593_vm8 = vcmp.lt.s32.totalorder %v592_v12, 0 }
  0xb8   : > { %v232_v13 = vsel %vm593_vm8, 0, %v592_v12 }
  0xb9   : > { %v233_v17 = vsub.s32 32, %v232_v13  ;;  %v237_v18 = vsub.s32 4294967266, %v232_v13  ;;  %v234_v19 = vshll.u32 %v225_v8, %v232_v13 }
  0xbb   : > { %v235_v20 = vshrl.u32 %v217_v15, %v233_v17  ;;  %v238_v21 = vadd.s32 127, %v237_v18 }
  0xbd   : > { %v236_v22 = vor.u32 %v235_v20, %v234_v19  ;;  %v239_v23 = vshll.u32 %v238_v21, 23 }
  0xbf   : > { %v240_v24 = vor.u32 4788187, %v239_v23  ;;  %v243_v26 = vcvt.s32.f32 %v236_v22 }
  0xc1   : > { %v241_v25 = vand.u32 2147483647, %v240_v24 }
  0xc3   : > { %v244_v27 = vmul.f32 %v243_v26, %v241_v25 }
  0xc5   : > { %v245_v28 = vxor.u32 2147483648, %v244_v27 }
  0xc7   : > { %v246_v30 = vsel %vm163_vm9, %v245_v28, %v244_v27 }
  0xc8   : > { %v249_v31 = vsel %vm162_vm10, %v677_v14, %v246_v30 }
  0xc9   : > { %624 = vcosq.f32 %v249_v31 }
  0xca   : > { %626 = vsinq.f32 %v249_v31 }
  0xd6   : > { %v625_v37 = vpop.eup %624 }
  0xd7   : > { %v627_v38 = vpop.eup %626  ;;  %v261_v39 = vxor.u32 2147483648, %v625_v37 }
  0xd8   : > { %v258_v40 = vxor.u32 2147483648, %v627_v38 }
  0xd9   : > { %v365_v41 = vsel %vm363_vm11, %v261_v39, %v627_v38  ;;  %v262_v16 = vsel %vm260_vm12, %v261_v39, %v627_v38 }
  0xda   : > { %v362_v42 = vsel %vm360_vm13, %v625_v37, %v258_v40  ;;  %v259_v43 = vsel %vm257_vm14, %v625_v37, %v258_v40 }
  0xdb   : > { %v366_v44 = vsel %vm359_vm15, %v362_v42, %v365_v41  ;;  %v263_v45 = vsel %vm256_vm0, %v259_v43, %v262_v16 }
  0xdc   : > { %v367_v46 = vsel %vm253_vm1, nan, %v366_v44  ;;  %v264_v47 = vsel %vm253_vm1, nan, %v263_v45 }
  0xdd   : > { %400 = vxpose.xlu1.b32.start.end [1/1] (short) %v367_v46, 128  ;;  %368 = vxpose.xlu0.b32.start.end [1/1] (short) %v264_v47, 128 }
 0x159   : > { %v416_v48 = vpop.trf.xlu1  ;;  %v384_v53 = vpop.trf.xlu0 }
 0x15a   : > { %448 = vrot.lane.b32.xlu1 %v416_v48, %s643_s17 }
 0x15d   : > { %v417_v49 = vpop.trf.xlu1  ;;  %v385_v56 = vpop.trf.xlu0 }
 0x15e   : > { %450 = vrot.lane.b32.xlu0 %v417_v49, %s643_s17 }
 0x161   : > { %v418_v50 = vpop.trf.xlu1  ;;  %v386_v58 = vpop.trf.xlu0 }
 0x162   : > { %452 = vrot.lane.b32.xlu1 %v418_v50, %s643_s17 }
 0x165   : > { %v419_v51 = vpop.trf.xlu1  ;;  %v387_v61 = vpop.trf.xlu0 }
 0x166   : > { %454 = vrot.lane.b32.xlu1 %v419_v51, %s643_s17 }
 0x169   : > { %v420_v14 = vpop.trf.xlu1  ;;  %v388_v63 = vpop.trf.xlu0 }
 0x16a   : > { %456 = vrot.lane.b32.xlu1 %v420_v14, %s643_s17 }
 0x16d   : > { %v421_v52 = vpop.trf.xlu1  ;;  %v389_v2 = vpop.trf.xlu0 }
 0x16e   : > { %458 = vrot.lane.b32.xlu1 %v421_v52, %s643_s17 }
 0x171   : > { %v422_v54 = vpop.trf.xlu1  ;;  %v390_v4 = vpop.trf.xlu0 }
 0x172   : > { %460 = vrot.lane.b32.xlu1 %v422_v54, %s643_s17 }
 0x175   : > { %v423_v55 = vpop.trf.xlu1  ;;  %v391_v6 = vpop.trf.xlu0 }
 0x176   : > { %462 = vrot.lane.b32.xlu1 %v423_v55, %s643_s17 }
 0x179   : > { %v424_v57 = vpop.trf.xlu1  ;;  %v392_v7 = vpop.trf.xlu0 }
 0x17a   : > { %464 = vrot.lane.b32.xlu1 %v424_v57, %s643_s17 }
 0x17d   : > { %v425_v59 = vpop.trf.xlu1  ;;  %v393_v8 = vpop.trf.xlu0 }
 0x17e   : > { %466 = vrot.lane.b32.xlu1 %v425_v59, %s643_s17 }
 0x181   : > { %v426_v60 = vpop.trf.xlu1  ;;  %v394_v9 = vpop.trf.xlu0 }
 0x182   : > { %468 = vrot.lane.b32.xlu1 %v426_v60, %s643_s17 }
 0x185   : > { %v427_v62 = vpop.trf.xlu1  ;;  %v395_v10 = vpop.trf.xlu0 }
 0x186   : > { %470 = vrot.lane.b32.xlu1 %v427_v62, %s643_s17 }
 0x189   : > { %v428_v0 = vpop.trf.xlu1  ;;  %v396_v11 = vpop.trf.xlu0 }
 0x18a   : > { %472 = vrot.lane.b32.xlu1 %v428_v0, %s643_s17 }
 0x18d   : > { %v429_v1 = vpop.trf.xlu1  ;;  %v397_v12 = vpop.trf.xlu0 }
 0x18e   : > { %474 = vrot.lane.b32.xlu0 %v429_v1, %s643_s17 }
 0x191   : > { %v430_v3 = vpop.trf.xlu1  ;;  %v398_v13 = vpop.trf.xlu0 }
 0x192   : > { %476 = vrot.lane.b32.xlu1 %v430_v3, %s643_s17 }
 0x195   : > { %v431_v5 = vpop.trf.xlu1  ;;  %v399_v15 = vpop.trf.xlu0 }
 0x196   : > { %478 = vrot.lane.b32.xlu0 %v431_v5, %s643_s17 }
 0x1cc   : > { %v449_v17 = vpop.permute.xlu1 %448 }
 0x1cd   : > { %v497_v18 = vsel %vm496_vm2, %v384_v53, %v449_v17 }
 0x1ce   : > { %514 = vst.msk [vmem:[%s718_s22] sm:$0xff] %vm513_vm3, %v497_v18 }
 0x1d0   : > { %v451_v19 = vpop.permute.xlu0 %450 }
 0x1d1   : > { %v498_v20 = vsel %vm496_vm2, %v385_v56, %v451_v19 }
 0x1d2   : > { %515 = vst.msk [vmem:[%s718_s22 + $0x8] sm:$0xff] %vm513_vm3, %v498_v20 }
 0x1d4   : > { %v453_v21 = vpop.permute.xlu1 %452 }
 0x1d5   : > { %v499_v22 = vsel %vm496_vm2, %v386_v58, %v453_v21 }
 0x1d6   : > { %516 = vst.msk [vmem:[%s718_s22 + $0x10] sm:$0xff] %vm513_vm3, %v499_v22 }
 0x1d8   : > { %v455_v23 = vpop.permute.xlu1 %454 }
 0x1d9   : > { %v500_v24 = vsel %vm496_vm2, %v387_v61, %v455_v23 }
 0x1da   : > { %517 = vst.msk [vmem:[%s718_s22 + $0x18] sm:$0xff] %vm513_vm3, %v500_v24 }
 0x1dc   : > { %v457_v25 = vpop.permute.xlu1 %456 }
 0x1dd   : > { %v501_v26 = vsel %vm496_vm2, %v388_v63, %v457_v25 }
 0x1de   : > { %518 = vst.msk [vmem:[%s718_s22 + $0x20] sm:$0xff] %vm513_vm3, %v501_v26 }
 0x1e0   : > { %v459_v27 = vpop.permute.xlu1 %458 }
 0x1e1   : > { %v502_v28 = vsel %vm496_vm2, %v389_v2, %v459_v27 }
 0x1e2   : > { %519 = vst.msk [vmem:[%s718_s22 + $0x28] sm:$0xff] %vm513_vm3, %v502_v28 }
 0x1e4   : > { %v461_v29 = vpop.permute.xlu1 %460 }
 0x1e5   : > { %v503_v30 = vsel %vm496_vm2, %v390_v4, %v461_v29 }
 0x1e6   : > { %520 = vst.msk [vmem:[%s718_s22 + $0x30] sm:$0xff] %vm513_vm3, %v503_v30 }
 0x1e8   : > { %v463_v31 = vpop.permute.xlu1 %462 }
 0x1e9   : > { %v504_v32 = vsel %vm496_vm2, %v391_v6, %v463_v31 }
 0x1ea   : > { %521 = vst.msk [vmem:[%s718_s22 + $0x38] sm:$0xff] %vm513_vm3, %v504_v32 }
 0x1ec   : > { %v465_v33 = vpop.permute.xlu1 %464 }
 0x1ed   : > { %v505_v34 = vsel %vm496_vm2, %v392_v7, %v465_v33 }
 0x1ee   : > { %522 = vst.msk [vmem:[%s718_s22 + $0x40] sm:$0xff] %vm513_vm3, %v505_v34 }
 0x1f0   : > { %v467_v35 = vpop.permute.xlu1 %466 }
 0x1f1   : > { %v506_v36 = vsel %vm496_vm2, %v393_v8, %v467_v35 }
 0x1f2   : > { %523 = vst.msk [vmem:[%s718_s22 + $0x48] sm:$0xff] %vm513_vm3, %v506_v36 }
 0x1f4   : > { %v469_v37 = vpop.permute.xlu1 %468 }
 0x1f5   : > { %v507_v38 = vsel %vm496_vm2, %v394_v9, %v469_v37 }
 0x1f6   : > { %524 = vst.msk [vmem:[%s718_s22 + $0x50] sm:$0xff] %vm513_vm3, %v507_v38 }
 0x1f8   : > { %v471_v39 = vpop.permute.xlu1 %470 }
 0x1f9   : > { %v508_v40 = vsel %vm496_vm2, %v395_v10, %v471_v39 }
 0x1fa   : > { %525 = vst.msk [vmem:[%s718_s22 + $0x58] sm:$0xff] %vm513_vm3, %v508_v40 }
 0x1fc   : > { %v473_v41 = vpop.permute.xlu1 %472 }
 0x1fd   : > { %v509_v16 = vsel %vm496_vm2, %v396_v11, %v473_v41 }
 0x1fe   : > { %526 = vst.msk [vmem:[%s718_s22 + $0x60] sm:$0xff] %vm513_vm3, %v509_v16 }
 0x200   : > { %v475_v42 = vpop.permute.xlu0 %474 }
 0x201   : > { %v510_v43 = vsel %vm496_vm2, %v397_v12, %v475_v42 }
 0x202   : > { %527 = vst.msk [vmem:[%s718_s22 + $0x68] sm:$0xff] %vm513_vm3, %v510_v43 }
 0x204   : > { %v477_v44 = vpop.permute.xlu1 %476 }
 0x205   : > { %v511_v45 = vsel %vm496_vm2, %v398_v13, %v477_v44 }
 0x206   : > { %528 = vst.msk [vmem:[%s718_s22 + $0x70] sm:$0xff] %vm513_vm3, %v511_v45 }
 0x208   : > { %v479_v46 = vpop.permute.xlu0 %478 }
 0x209   : > { %v512_v47 = vsel %vm496_vm2, %v399_v15, %v479_v46 }
 0x20a   : > { %529 = vst.msk [vmem:[%s718_s22 + $0x78] sm:$0xff] %vm513_vm3, %v512_v47 }
 0x20b PF: > { %s12_s9 = sadd.s32 1, %s634_s9  }
 0x20c   : > { %p9_p5 = scmp.ge.s32.totalorder %s12_s9, 4  }
 0x20e   :  { %11 = sbr.rel (!%p9_p5) target bundleno = 1 (0x1), region = 58 }

</bundles_post_ra>
